<compile_context>
chip_gen: v6e
topology: v6e:2x2x1
jax: 0.10.0
libtpu: 0.0.40
codegen_flags: <defaults>
</compile_context>

<pallas_src>
import functools

import jax
import jax.numpy as jnp
from jax.experimental import pallas as pl
from jax.experimental.pallas import tpu as pltpu


def _round_up(x: int, m: int) -> int:
    return ((x + m - 1) // m) * m


def _vmem_budget_bytes() -> int:
    # Generation-aware VMEM budget: ~3/4 of physical VMEM
    # (v5e/v6e: 128 MiB -> 96 MiB, v7x: 64 MiB -> 48 MiB), leaving headroom
    # for double-buffers already accounted below plus Mosaic internal scratch.
    try:
        cap = int(pltpu.get_tpu_info().vmem_capacity_bytes)
    except Exception:
        cap = 64 * 1024 * 1024
    return (cap * 3) // 4


def _aligned_divisors_desc(total: int, align: int, cap: int):
    """Multiples of `align` that evenly divide `total`, <= cap, descending."""
    out = []
    t = align
    limit = min(total, cap)
    while t <= limit:
        if total % t == 0:
            out.append(t)
        t += align
    if not out:
        out = [min(total, align)]
    return sorted(out, reverse=True)


# --------------------------------------------------------------------------
# Kernels
# --------------------------------------------------------------------------
def _linear_resident_kernel(x_ref, w_ref, b_ref, o_ref):
    # x_ref: (tm, K_pad), w_ref: (K_pad, tn) [K-major, pre-transposed],
    # b_ref: (1, tn), o_ref: (tm, tn).  Full-K dot on the MXU, f32 accumulate,
    # bias added once in f32, then cast to the output dtype.
    acc = jnp.dot(x_ref[...], w_ref[...], preferred_element_type=jnp.float32)
    o_ref[...] = (acc + b_ref[...].astype(jnp.float32)).astype(o_ref.dtype)


def _linear_tiled_kernel(x_ref, w_ref, b_ref, o_ref, acc_ref):
    # K-tiled fallback: x_ref (tm, tk), w_ref (tk, tn), acc_ref (tm, tn) f32.
    k = pl.program_id(2)

    @pl.when(k == 0)
    def _():
        acc_ref[...] = jnp.zeros_like(acc_ref)

    acc_ref[...] += jnp.dot(x_ref[...], w_ref[...],
                            preferred_element_type=jnp.float32)

    @pl.when(k == pl.num_programs(2) - 1)
    def _():
        o_ref[...] = (acc_ref[...] + b_ref[...].astype(jnp.float32)).astype(o_ref.dtype)


# --------------------------------------------------------------------------
# One-time parameter preparation (outside the per-call hot path)
# --------------------------------------------------------------------------
def prepare_linear_params(weight, bias):
    """PyTorch weight [N, K] -> padded, K-major [K_pad, N_pad]; bias -> (1, N_pad).

    Done once at init so the forward never re-pads / re-transposes W in HBM.
    """
    N, K = weight.shape
    K_pad = _round_up(K, 128)
    N_pad = _round_up(N, 128)
    w_kn = jnp.transpose(weight)  # [K, N]
    if (K_pad, N_pad) != (K, N):
        w_kn = jnp.pad(w_kn, ((0, K_pad - K), (0, N_pad - N)))
    b = bias
    if N_pad != N:
        b = jnp.pad(b, (0, N_pad - N))
    return w_kn, b.reshape(1, N_pad), N


# --------------------------------------------------------------------------
# Forward
# --------------------------------------------------------------------------
@functools.partial(jax.jit, static_argnames=("n_out",))
def linear_forward(x, w_kn, b2d, *, n_out):
    """x: [..., K]; w_kn: [K_pad, N_pad] (prepared); b2d: [1, N_pad]."""
    *lead, K = x.shape
    K_pad, N_pad = w_kn.shape
    M = 1
    for d in lead:
        M *= d
    x2d = x.reshape(M, K)

    x_isz = x.dtype.itemsize
    w_isz = w_kn.dtype.itemsize
    o_isz = x.dtype.itemsize
    b_isz = b2d.dtype.itemsize
    budget = int(_vmem_budget_bytes())

    # ---- tm: minimize M-padding waste, prefer larger tiles on ties -------
    if M >= 128:
        tm = min((512, 256, 128), key=lambda c: (_round_up(M, c) - M, -c))
    else:
        tm = _round_up(max(M, 1), 8)
    M_pad = _round_up(M, tm)

    if (M_pad, K_pad) != (M, K):
        x2d = jnp.pad(x2d, ((0, M_pad - M), (0, K_pad - K)))

    cost = pl.CostEstimate(
        flops=2 * M * n_out * K,
        transcendentals=0,
        bytes_accessed=(M * K * x_isz + K * n_out * w_isz
                        + n_out * b_isz + M * n_out * o_isz),
    )

    # ---- schedule selection ------------------------------------------------
    def resident_bytes(tn):
        return (2 * tm * K_pad * x_isz        # x tiles (double-buffered)
                + 2 * K_pad * tn * w_isz      # weight slab (double-buffered)
                + 2 * tm * tn * o_isz         # output tiles
                + 2 * tn * b_isz)             # bias tile

    tn_res = None
    for tn_cand in _aligned_divisors_desc(N_pad, 128, 8192):
        if resident_bytes(tn_cand) <= budget:
            tn_res = tn_cand
            break
    use_resident = tn_res is not None and (tn_res == N_pad or tn_res >= 256)

    if use_resident:
        # Weight-resident: grid over (N-slabs, M-tiles), N outermost so each
        # weight slab is DMA'd once and stays in VMEM while M tiles stream.
        tn = tn_res
        grid = (N_pad // tn, M_pad // tm)
        out2d = pl.pallas_call(
            _linear_resident_kernel,
            out_shape=jax.ShapeDtypeStruct((M_pad, N_pad), x.dtype),
            grid_spec=pltpu.PrefetchScalarGridSpec(
                num_scalar_prefetch=0,
                grid=grid,
                in_specs=[
                    pl.BlockSpec((tm, K_pad), lambda j, i: (i, 0)),   # x tile
                    pl.BlockSpec((K_pad, tn), lambda j, i: (0, j)),   # weight slab (resident)
                    pl.BlockSpec((1, tn), lambda j, i: (0, j)),       # bias slab
                ],
                out_specs=pl.BlockSpec((tm, tn), lambda j, i: (i, j)),
            ),
            compiler_params=pltpu.CompilerParams(
                dimension_semantics=("parallel", "parallel"),
                vmem_limit_bytes=budget,
            ),
            cost_estimate=cost,
        )(x2d, w_kn, b2d)
    else:
        # K-tiled fallback with large tiles and an f32 VMEM accumulator.
        tn = _aligned_divisors_desc(N_pad, 128, 512)[0]
        tk = 128
        for tk_cand in _aligned_divisors_desc(K_pad, 128, 2048):
            need = (2 * tm * tk_cand * x_isz + 2 * tk_cand * tn * w_isz
                    + 2 * tm * tn * o_isz + tm * tn * 4 + 2 * tn * b_isz)
            if need <= budget:
                tk = tk_cand
                break
        grid = (M_pad // tm, N_pad // tn, K_pad // tk)
        out2d = pl.pallas_call(
            _linear_tiled_kernel,
            out_shape=jax.ShapeDtypeStruct((M_pad, N_pad), x.dtype),
            grid_spec=pltpu.PrefetchScalarGridSpec(
                num_scalar_prefetch=0,
                grid=grid,
                in_specs=[
                    pl.BlockSpec((tm, tk), lambda i, j, k: (i, k)),   # x tile
                    pl.BlockSpec((tk, tn), lambda i, j, k: (k, j)),   # weight tile [K, N]
                    pl.BlockSpec((1, tn), lambda i, j, k: (0, j)),    # bias tile
                ],
                out_specs=pl.BlockSpec((tm, tn), lambda i, j, k: (i, j)),
                scratch_shapes=[pltpu.VMEM((tm, tn), jnp.float32)],
            ),
            compiler_params=pltpu.CompilerParams(
                dimension_semantics=("parallel", "parallel", "arbitrary"),
                vmem_limit_bytes=budget,
            ),
            cost_estimate=cost,
        )(x2d, w_kn, b2d)

    if (M_pad, N_pad) != (M, n_out):
        out2d = out2d[:M, :n_out]
    return out2d.reshape(*lead, n_out)


def xavier_uniform(key, out_features, in_features, dtype=jnp.float32):
    # Xavier (Glorot) uniform init, matching nn.init.xavier_uniform_ semantics.
    limit = (6.0 / (in_features + out_features)) ** 0.5
    return jax.random.uniform(
        key, (out_features, in_features), dtype=dtype, minval=-limit, maxval=limit
    )


if __name__ == "__main__":
    key = jax.random.PRNGKey(0)
    k_x, k_w, k_b = jax.random.split(key, 3)

    batch, seq, in_features, out_features = 2, 8, 32, 64

    x = jax.random.normal(k_x, (batch, seq, in_features), dtype=jnp.float32)
    weight = xavier_uniform(k_w, out_features, in_features)  # [N, K], torch layout
    # nn.Linear default bias init (uniform in [-1/sqrt(K), 1/sqrt(K)])
    bound = 1.0 / (in_features ** 0.5)
    bias = jax.random.uniform(
        k_b, (out_features,), dtype=jnp.float32, minval=-bound, maxval=bound
    )

    # One-time parameter prep (outside the per-call hot path).
    w_kn, b2d, n_out = prepare_linear_params(weight, bias)
    jax.block_until_ready((w_kn, b2d))

    out = linear_forward(x, w_kn, b2d, n_out=n_out)
    jax.block_until_ready(out)

    # sanity check against plain JAX reference
    ref = x @ weight.T + bias
    assert out.shape == (batch, seq, out_features)
    assert jnp.allclose(out, ref, atol=1e-5, rtol=1e-5)

    print("KERNEL_OK")
</pallas_src>

<mosaic_0001>
module attributes {stable_mosaic.version = 11 : i64} {
  func.func @_linear_resident_kernel(%arg0: i32, %arg1: i32, %arg2: memref<16x128xf32, #tpu.memory_space<vmem>>, %arg3: memref<128x128xf32, #tpu.memory_space<vmem>>, %arg4: memref<1x128xf32, #tpu.memory_space<vmem>>, %arg5: memref<16x128xf32, #tpu.memory_space<vmem>>) attributes {dimension_semantics = [#tpu.dimension_semantics<parallel>, #tpu.dimension_semantics<parallel>], iteration_bounds = array<i64: 1, 1>, scalar_prefetch = 0 : i64, scratch_operands = 0 : i64, tpu.core_type = #tpu.core_type<tc>, window_params = [{transform_indices = @transform_0, window_bounds = array<i64: 16, 128>}, {transform_indices = @transform_1, window_bounds = array<i64: 128, 128>}, {transform_indices = @transform_2, window_bounds = array<i64: 1, 128>}, {transform_indices = @transform_3, window_bounds = array<i64: 16, 128>}]} {
    %c0 = arith.constant 0 : index
    %c0_0 = arith.constant 0 : index
    %0 = vector.load %arg2[%c0, %c0_0] : memref<16x128xf32, #tpu.memory_space<vmem>>, vector<16x128xf32>
    %c0_1 = arith.constant 0 : index
    %c0_2 = arith.constant 0 : index
    %1 = vector.load %arg3[%c0_1, %c0_2] : memref<128x128xf32, #tpu.memory_space<vmem>>, vector<128x128xf32>
    %cst = arith.constant dense<0.000000e+00> : vector<16x128xf32>
    %2 = tpu.matmul %0, %1, %cst {dimension_numbers = #tpu.dot_dimension_numbers<[1], [0], [0], [1], [0, 0, 1, 1], [], []>} : vector<16x128xf32>, vector<128x128xf32>, vector<16x128xf32> -> vector<16x128xf32>
    %c0_3 = arith.constant 0 : index
    %c0_4 = arith.constant 0 : index
    %3 = vector.load %arg4[%c0_3, %c0_4] : memref<1x128xf32, #tpu.memory_space<vmem>>, vector<1x128xf32>
    %4 = vector.broadcast %3 : vector<1x128xf32> to vector<16x128xf32>
    %5 = arith.addf %2, %4 : vector<16x128xf32>
    %c0_5 = arith.constant 0 : index
    %c0_6 = arith.constant 0 : index
    %6 = vector.load %arg5[%c0_5, %c0_6] : memref<16x128xf32, #tpu.memory_space<vmem>>, vector<16x128xf32>
    tpu.vector_store %arg5[%c0_5, %c0_6], %5 {strides = array<i32>} : memref<16x128xf32, #tpu.memory_space<vmem>>, vector<16x128xf32>,
    return
  }
  func.func @transform_0(%arg0: i32, %arg1: i32) -> (i32, i32) {
    %c0_i32 = arith.constant 0 : i32
    %c0_i32_0 = arith.constant 0 : i32
    return %arg1, %c0_i32 : i32, i32
  }
  func.func @transform_1(%arg0: i32, %arg1: i32) -> (i32, i32) {
    %c0_i32 = arith.constant 0 : i32
    %c0_i32_0 = arith.constant 0 : i32
    return %c0_i32, %arg0 : i32, i32
  }
  func.func @transform_2(%arg0: i32, %arg1: i32) -> (i32, i32) {
    %c0_i32 = arith.constant 0 : i32
    %c0_i32_0 = arith.constant 0 : i32
    return %c0_i32, %arg0 : i32, i32
  }
  func.func @transform_3(%arg0: i32, %arg1: i32) -> (i32, i32) {
    %c0_i32 = arith.constant 0 : i32
    return %arg1, %arg0 : i32, i32
  }
}

</mosaic_0001>

<bundles_post_ra>
// kernel: linear_forward.1
= control target key start
LH: loop header
LB: loop body
LE: loop exit
PB: predicated region body
PF: predicated region fallthrough
CT: control target
= control target key end

     0   :  { %8 = vsyncpa [#allocation3], 0  ;;  %s214_s12 = smov [#allocation2]   ;;  %s255_s0 = inlined_call_operand.vmem [shape: f32[16,128], index: 0, kind: input, shape index: {}]   ;;  %s256_s1 = inlined_call_operand.hbm [shape: f32[128,128], index: 1, kind: input, shape index: {}]   ;;  %s257_s2 = inlined_call_operand.vmem [shape: f32[1,128], index: 2, kind: input, shape index: {}]   ;;  %s258_s3 = inlined_call_operand.vmem [shape: f32[16,128], index: 3, kind: output, shape index: {}]  }
   0x1   :  { %s16_s13 = sshll.u32 %s214_s12, 4  ;;  %s17_s13 = int_to_ptr.vmem [resolvable:$true] %s16_s13 }
   0x2   :  { %s200_s14 = scalar_lea.vmem %s17_s13, 2048  ;;  %p205_p1 = scmp.lt.s32.totalorder %s17_s13, %s17_s13 }
   0x3   :  { %p201_p0 = scmp.ne.s32.totalorder %s17_s13, %s200_s14  ;;  %p206_p2 = scmp.lt.s32.totalorder %s200_s14, %s200_s14 }
   0x5   :  { %p207_p3 = por %p206_p2, %p205_p1 }
   0x7   :  { %p208_p4 = pnand %p207_p3, %p201_p0 }
   0x9   :  { %211 = shalt.err (!%p208_p4)
}
   0xa   :  { %s215_s15 = smov 128   ;;  %s216_s16 = smov 8  }
   0xb   :  { %22 = dma.hbm_to_vmem [thread:$0]  %s256_s1, 2048, %s17_s13, [#allocation3], %s215_s15, %s215_s15, %s216_s16  }
   0xc   :  { %212 = dma.done.wait [#allocation3], 2048  }
   0xd   :  { %213 = vsyncadd [#allocation3], 4294965248  ;;  %v45_v0 = vld [vmem:[#allocation2 + $0x78] sm:$0xff]  ;;  %v44_v1 = vld [vmem:[#allocation2 + $0x70] sm:$0xff] }
   0xe   :  { %154 = vmatprep.subr.mxu0 %v45_v0  ;;  %v43_v2 = vld [vmem:[#allocation2 + $0x68] sm:$0xff]  ;;  %v42_v3 = vld [vmem:[#allocation2 + $0x60] sm:$0xff]  ;;  %v41_v5 = vld [vmem:[#allocation2 + $0x58] sm:$0xff] }
   0xf   :  { %155 = vmatpush3.msra.mxu0 %v45_v0  ;;  %v28_v4 = vld [vmem:[%s255_s0] sm:$0xff]  ;;  %v40_v6 = vld [vmem:[#allocation2 + $0x50] sm:$0xff]  ;;  %v39_v7 = vld [vmem:[#allocation2 + $0x48] sm:$0xff] }
  0x10   :  { %156 = vmatprep.subr.mxu0 %v44_v1  ;;  %186 = vmatprep.mubr.f32.mxu0 %v28_v4  ;;  %v38_v8 = vld [vmem:[#allocation2 + $0x40] sm:$0xff]  ;;  %v37_v9 = vld [vmem:[#allocation2 + $0x38] sm:$0xff]  ;;  %v36_v10 = vld [vmem:[#allocation2 + $0x30] sm:$0xff] }
  0x11   :  { %157 = vmatpush3.msra.mxu0 %v44_v1  ;;  %v35_v11 = vld [vmem:[#allocation2 + $0x28] sm:$0xff]  ;;  %v34_v12 = vld [vmem:[#allocation2 + $0x20] sm:$0xff]  ;;  %v33_v13 = vld [vmem:[#allocation2 + $0x18] sm:$0xff] }
  0x12   :  { %158 = vmatprep.subr.mxu0 %v43_v2  ;;  %v32_v14 = vld [vmem:[#allocation2 + $0x10] sm:$0xff]  ;;  %v31_v15 = vld [vmem:[#allocation2 + $0x8] sm:$0xff]  ;;  %v30_v16 = vld [vmem:[#allocation2] sm:$0xff] }
  0x13   :  { %159 = vmatpush3.msra.mxu0 %v43_v2  ;;  %v29_v17 = vld [vmem:[%s255_s0 + $0x8] sm:$0xff]  ;;  %v135_v18 = vld [vmem:[%s257_s2] ss:$0 sm:$0xff] }
  0x14   :  { %160 = vmatprep.subr.mxu0 %v42_v3 }
  0x15   :  { %161 = vmatpush3.msra.mxu0 %v42_v3 }
  0x16   :  { %162 = vmatprep.subr.mxu0 %v41_v5 }
  0x17   :  { %163 = vmatpush3.msra.mxu0 %v41_v5 }
  0x18   :  { %164 = vmatprep.subr.mxu0 %v40_v6 }
  0x19   :  { %165 = vmatpush3.msra.mxu0 %v40_v6 }
  0x1a   :  { %166 = vmatprep.subr.mxu0 %v39_v7 }
  0x1b   :  { %167 = vmatpush3.msra.mxu0 %v39_v7 }
  0x1c   :  { %168 = vmatprep.subr.mxu0 %v38_v8 }
  0x1d   :  { %169 = vmatpush3.msra.mxu0 %v38_v8 }
  0x1e   :  { %170 = vmatprep.subr.mxu0 %v37_v9 }
  0x1f   :  { %171 = vmatpush3.msra.mxu0 %v37_v9 }
  0x20   :  { %172 = vmatprep.subr.mxu0 %v36_v10 }
  0x21   :  { %173 = vmatpush3.msra.mxu0 %v36_v10 }
  0x22   :  { %174 = vmatprep.subr.mxu0 %v35_v11 }
  0x23   :  { %175 = vmatpush3.msra.mxu0 %v35_v11 }
  0x24   :  { %176 = vmatprep.subr.mxu0 %v34_v12 }
  0x25   :  { %177 = vmatpush3.msra.mxu0 %v34_v12 }
  0x26   :  { %178 = vmatprep.subr.mxu0 %v33_v13 }
  0x27   :  { %179 = vmatpush3.msra.mxu0 %v33_v13 }
  0x28   :  { %180 = vmatprep.subr.mxu0 %v32_v14 }
  0x29   :  { %181 = vmatpush3.msra.mxu0 %v32_v14 }
  0x2a   :  { %182 = vmatprep.subr.mxu0 %v31_v15 }
  0x2b   :  { %183 = vmatpush3.msra.mxu0 %v31_v15 }
  0x2c   :  { %184 = vmatprep.subr.mxu0 %v30_v16 }
  0x2d   :  { %185 = vmatpush3.msra.mxu0 %v30_v16 }
  0x2e   :  { %187 = vmatmul.mubr.f32.vlgmr.msra.gmra.mxu0 %v29_v17 }
  0xee   :  { %v188_v19 = vpop.f32.mrf.mxu0 }
  0xef   :  { %v125_v20 = vadd.f32 %v188_v19, %v135_v18 }
  0xf0   :  { %v119_v21 = vpop.f32.mrf.mxu0 }
  0xf1   :  { %129 = vst [vmem:[%s258_s3 + $0x8] sm:$0xff] %v125_v20  ;;  %v120_v22 = vadd.f32 %v135_v18, %v119_v21 }
  0xf3   :  { %128 = vst [vmem:[%s258_s3] sm:$0xff] %v120_v22 }
  0xf4   :  { %134 = vsyncpa [#allocation3], 1 }

</bundles_post_ra>
